<compile_context>
chip_gen: v7x
topology: tpu7x:2x2x1
jax: 0.10.0
libtpu: 0.0.40
codegen_flags: <defaults>
</compile_context>

<pallas_src>
import math

import jax
import jax.numpy as jnp
from jax.experimental import pallas as pl
from jax.experimental.pallas import tpu as pltpu


def _layer_centering_kernel(x_ref, bias_ref, y_ref):
    # x_ref: (tile_m, L) in native dtype; bias_ref: (tile_m, 1) f32 (shared
    # block, constant index_map -> resident in VMEM across grid steps).
    x = x_ref[...]
    inv_l = 1.0 / x.shape[1]
    # Per-row mean over the lane (H*W) axis, accumulated in f32.
    row_sum = jnp.sum(x, axis=1, keepdims=True, dtype=jnp.float32)
    shift = bias_ref[...] - row_sum * inv_l          # (tile_m, 1) f32
    if x.dtype == jnp.float32:
        y_ref[...] = x + shift
    else:
        # Do the subtraction/add in f32, cast only on store (accuracy; the
        # extra VPU work is hidden under HBM traffic).
        y_ref[...] = (x.astype(jnp.float32) + shift).astype(y_ref.dtype)


def layer_centering_forward(x, bias=None, dim=(-2, -1)):
    """Forward pass of LayerCentering.

    x:    (N, C, *) tensor; mean is taken over the trailing dims in `dim`.
    bias: (C,) learnable bias or None.
    Returns y with the same shape/dtype as x.
    """
    shape = x.shape
    ndim = len(shape)
    dims = tuple(d % ndim for d in dim)
    # Requires the reduction dims to be trailing contiguous dims (true for the
    # module default dim=(-2, -1) on NCHW inputs).
    assert dims == tuple(range(ndim - len(dims), ndim)), (
        "reduction dims must be trailing contiguous dims")

    lead_shape = shape[: ndim - len(dims)]
    red_shape = shape[ndim - len(dims):]
    M = 1
    for s in lead_shape:
        M *= s
    L = 1
    for s in red_shape:
        L *= s
    C = shape[1]
    assert M % C == 0  # M = N * C by construction of the module's input shape

    # Free view in the native memory layout: rows = (N*C), lanes = (H*W).
    x2d = x.reshape(M, L)

    itemsize = jnp.dtype(x.dtype).itemsize
    # Sublane packing granularity per dtype width.
    pack = {4: 8, 2: 16, 1: 32}.get(itemsize, 8)
    # Row granularity: multiple of the sublane packing AND of C, so a single
    # shared (tile_m, 1) bias block lines up with every row tile.
    gran = (pack * C) // math.gcd(pack, C)

    # Target ~2 MiB of x-data per block (HBM-bandwidth-bound regime).
    target_block_bytes = 2 << 20
    tile_m = max(1, target_block_bytes // max(1, L * itemsize))
    # Keep at least 2 grid steps when M allows it, so the "parallel" grid axis
    # can shard across the two v7x TensorCores.
    if M >= 2 * gran:
        tile_m = min(tile_m, M // 2)
    # Round down to the row granularity; clamp to [gran, M].
    tile_m = max(gran, (tile_m // gran) * gran)
    if tile_m >= M:
        tile_m = M  # single full block (M is a multiple of C)

    grid = (pl.cdiv(M, tile_m),)

    # Bias: a single (tile_m, 1) f32 block, reused (constant index_map) across
    # all grid steps — no (M, 1) HBM materialization.
    if bias is None:
        bias_block = jnp.zeros((tile_m, 1), dtype=jnp.float32)
    else:
        bias_block = jnp.tile(
            bias.astype(jnp.float32), tile_m // C).reshape(tile_m, 1)

    # VMEM limit from the actual footprint: double-buffered input + output
    # tiles plus the (tiny) bias block, with headroom.  Stays well inside
    # v7x's 64 MiB physical VMEM for the ~2 MiB block target.
    block_bytes = tile_m * L * itemsize
    footprint = 4 * block_bytes + 2 * tile_m * 4
    vmem_limit = int(max(16 << 20, min(2 * footprint, 96 << 20)))

    y2d = pl.pallas_call(
        _layer_centering_kernel,
        out_shape=jax.ShapeDtypeStruct((M, L), x.dtype),
        grid=grid,
        in_specs=[
            pl.BlockSpec((tile_m, L), lambda i: (i, 0)),
            pl.BlockSpec((tile_m, 1), lambda i: (0, 0)),   # shared, resident
        ],
        out_specs=pl.BlockSpec((tile_m, L), lambda i: (i, 0)),
        compiler_params=pltpu.CompilerParams(
            dimension_semantics=("parallel",),
            vmem_limit_bytes=vmem_limit,
        ),
    )(x2d, bias_block)

    return y2d.reshape(shape)


if __name__ == "__main__":
    key = jax.random.PRNGKey(0)
    kx, kb = jax.random.split(key)

    N, C, H, W = 2, 4, 16, 16
    x = jax.random.normal(kx, (N, C, H, W), dtype=jnp.float32)
    # Module init is zeros; use a small nonzero bias so the bias path is tested.
    bias = 0.1 * jax.random.normal(kb, (C,), dtype=jnp.float32)

    y = layer_centering_forward(x, bias)
    y = jax.block_until_ready(y)

    # Pure-JAX reference of the PyTorch semantics.
    mean_ref = x.mean(axis=(-2, -1), keepdims=True)
    y_ref = x - mean_ref + bias.reshape(1, C, 1, 1)

    assert y.shape == x.shape and y.dtype == x.dtype
    assert jnp.allclose(y, y_ref, atol=1e-5, rtol=1e-5)

    # Also exercise the no-bias path and a multi-tile (grid > 1) shape.
    x2 = jax.random.normal(kx, (8, 4, 16, 16), dtype=jnp.float32)
    y2 = jax.block_until_ready(layer_centering_forward(x2, None))
    y2_ref = x2 - x2.mean(axis=(-2, -1), keepdims=True)
    assert jnp.allclose(y2, y2_ref, atol=1e-5, rtol=1e-5)

    print("KERNEL_OK")
</pallas_src>

<mosaic_0001>
module attributes {stable_mosaic.version = 11 : i64} {
  func.func @_layer_centering_kernel(%arg0: i32, %arg1: memref<8x256xf32, #tpu.memory_space<vmem>>, %arg2: memref<8x1xf32, #tpu.memory_space<vmem>>, %arg3: memref<8x256xf32, #tpu.memory_space<vmem>>) attributes {dimension_semantics = [#tpu.dimension_semantics<parallel>], iteration_bounds = array<i64: 1>, scalar_prefetch = 0 : i64, scratch_operands = 0 : i64, tpu.core_type = #tpu.core_type<tc>, window_params = [{transform_indices = @transform_0, window_bounds = array<i64: 8, 256>}, {pipeline_mode = #tpu.pipeline_mode<synchronous>, transform_indices = @transform_1, window_bounds = array<i64: 8, 1>}, {transform_indices = @transform_2, window_bounds = array<i64: 8, 256>}]} {
    %c0 = arith.constant 0 : index
    %c0_0 = arith.constant 0 : index
    %0 = vector.load %arg1[%c0, %c0_0] : memref<8x256xf32, #tpu.memory_space<vmem>>, vector<8x256xf32>
    %cst = arith.constant dense<0.000000e+00> : vector<8xf32>
    %1 = vector.multi_reduction <add>, %0, %cst [1] : vector<8x256xf32> to vector<8xf32>
    %2 = vector.shape_cast %1 : vector<8xf32> to vector<8x1xf32>
    %c0_1 = arith.constant 0 : index
    %c0_2 = arith.constant 0 : index
    %3 = vector.load %arg2[%c0_1, %c0_2] : memref<8x1xf32, #tpu.memory_space<vmem>>, vector<8x1xf32>
    %cst_3 = arith.constant 3.906250e-03 : f32
    %4 = vector.broadcast %cst_3 : f32 to vector<8x1xf32>
    %5 = arith.mulf %2, %4 : vector<8x1xf32>
    %6 = arith.subf %3, %5 : vector<8x1xf32>
    %7 = vector.broadcast %6 : vector<8x1xf32> to vector<8x256xf32>
    %8 = arith.addf %0, %7 : vector<8x256xf32>
    %c0_4 = arith.constant 0 : index
    %c0_5 = arith.constant 0 : index
    %9 = vector.load %arg3[%c0_4, %c0_5] : memref<8x256xf32, #tpu.memory_space<vmem>>, vector<8x256xf32>
    tpu.vector_store %arg3[%c0_4, %c0_5], %8 {strides = array<i32>} : memref<8x256xf32, #tpu.memory_space<vmem>>, vector<8x256xf32>,
    return
  }
  func.func @transform_0(%arg0: i32) -> (i32, i32) {
    %c0_i32 = arith.constant 0 : i32
    %c0_i32_0 = arith.constant 0 : i32
    return %arg0, %c0_i32 : i32, i32
  }
  func.func @transform_1(%arg0: i32) -> (i32, i32) {
    %c0_i32 = arith.constant 0 : i32
    %c0_i32_0 = arith.constant 0 : i32
    %c0_i32_1 = arith.constant 0 : i32
    return %c0_i32, %c0_i32_0 : i32, i32
  }
  func.func @transform_2(%arg0: i32) -> (i32, i32) {
    %c0_i32 = arith.constant 0 : i32
    %c0_i32_0 = arith.constant 0 : i32
    return %arg0, %c0_i32 : i32, i32
  }
}

</mosaic_0001>

<bundles_post_ra>
// kernel: tpu_custom_call.1
= control target key start
LH: loop header
LB: loop body
LE: loop exit
PB: predicated region body
PF: predicated region fallthrough
CT: control target
= control target key end

     0   :  { %7 = vsyncpa [#allocation3], 0  ;;  %s153_s0 = inlined_call_operand.hbm [shape: f32[8,256], index: 0, kind: input, shape index: {}]   ;;  %s154_s1 = inlined_call_operand.vmem [shape: f32[8,1], index: 1, kind: input, shape index: {}]   ;;  %s155_s2 = inlined_call_operand.hbm [shape: f32[8,256], index: 2, kind: output, shape index: {}]  }
   0x1   :  { %8 = vsyncpa [#allocation4], 0  ;;  %s108_s9 = smov [#allocation2]   ;;  %s60_s13 = scalar_lea.hbm %s153_s0, 256 }
   0x2   :  { %s15_s10 = sshll.u32 %s108_s9, 4  ;;  %p61_p0 = scmp.ne.s32.totalorder %s153_s0, %s60_s13  ;;  %s16_s10 = int_to_ptr.vmem [resolvable:$true] %s15_s10 }
   0x3   :  { %p64_p1 = scmp.lt.u32.totalorder %s60_s13, %s153_s0 }
   0x5   :  { %p66_p2 = pnand %p64_p1, %p61_p0 }
   0x7   :  { %69 = shalt.err (!%p66_p2)
}
   0x8   :  { %s70_s18 = scalar_lea.vmem %s16_s10, 256  ;;  %p75_p4 = scmp.lt.s32.totalorder %s16_s10, %s16_s10 }
   0x9   :  { %p71_p3 = scmp.ne.s32.totalorder %s16_s10, %s70_s18  ;;  %p76_p5 = scmp.lt.s32.totalorder %s70_s18, %s70_s18 }
   0xb   :  { %p77_p6 = por %p76_p5, %p75_p4 }
   0xd   :  { %p78_p7 = pnand %p77_p6, %p71_p3 }
   0xf   :  { %81 = shalt.err (!%p78_p7)
}
  0x10   :  { %18 = dma.hbm_to_vmem [thread:$0]  %s153_s0, 256, %s16_s10, [#allocation3]  }
  0x11   :  { %104 = dma.done.wait [#allocation3], 256  }
  0x12   :  { %105 = vsyncadd [#allocation3], 4294967040  ;;  %v24_v0 = vld [vmem:[#allocation2] sm:$0xff]  ;;  %v25_v1 = vld [vmem:[#allocation2 + $0x8] sm:$0xff]  ;;  %v109_v3 = vmov 0   ;;  %s110_s23 = smov [#allocation5]  }
  0x13   :  { %v26_v2 = vadd.f32 %v25_v1, %v24_v0  ;;  %59 = vset.pattern.permute.xlu0 %v109_v3  ;;  %v29_v4 = vld [vmem:[%s154_s1] sm:$0xff]  ;;  %s47_s24 = sshll.u32 %s110_s23, 4  ;;  %s48_s24 = int_to_ptr.vmem [resolvable:$true] %s47_s24 }
  0x14   :  { %s82_s0 = scalar_lea.vmem %s48_s24, 256  ;;  %p87_p9 = scmp.lt.s32.totalorder %s48_s24, %s48_s24 }
  0x15   :  { %27 = vadd.xlane.f32.xlu0 %v26_v2  ;;  %p83_p8 = scmp.ne.s32.totalorder %s48_s24, %s82_s0  ;;  %p88_p10 = scmp.lt.s32.totalorder %s82_s0, %s82_s0 }
  0x17   :  { %p89_p11 = por %p88_p10, %p87_p9 }
  0x19   :  { %p90_p12 = pnand %p89_p11, %p83_p8 }
  0xa2   :  { %v28_v5 = vpop.xlane.xlu0 %27 }
  0xa3   :  { %v30_v6 = vmul.f32 0.00390625, %v28_v5 }
  0xa5   :  { %v31_v7 = vsub.f32 %v29_v4, %v30_v6 }
  0xa7   :  { %34 = vperm.xlu0 %59, %v31_v7  }
 0x126   :  { %v35_v8 = vpop.permute.xlu0 %34 }
 0x127   :  { %v37_v9 = vadd.f32 %v35_v8, %v24_v0  ;;  %v38_v10 = vadd.f32 %v35_v8, %v25_v1 }
 0x129   :  { %39 = vst [vmem:[#allocation5] sm:$0xff] %v37_v9  ;;  %40 = vst [vmem:[#allocation5 + $0x8] sm:$0xff] %v38_v10 }
 0x12a   :  { %93 = shalt.err (!%p90_p12)
}
 0x12b   :  { %s94_s26 = scalar_lea.hbm %s155_s2, 256 }
 0x12c   :  { %p95_p13 = scmp.ne.s32.totalorder %s155_s2, %s94_s26  ;;  %p98_p0 = scmp.lt.u32.totalorder %s94_s26, %s155_s2 }
 0x12e   :  { %p100_p1 = pnand %p98_p0, %p95_p13 }
 0x130   :  { %103 = shalt.err (!%p100_p1)
}
 0x131   :  { %50 = dma.vmem_to_hbm [thread:$0]  %s48_s24, 256, %s155_s2, [#allocation4]  }
 0x132   :  { %106 = dma.done.wait [#allocation4], 256  }
 0x133   :  { %107 = vsyncadd [#allocation4], 4294967040 }
 0x134   :  { %54 = vsyncpa [#allocation3], 1 }
 0x135   :  { %55 = vsyncpa [#allocation4], 1 }

</bundles_post_ra>
